<compile_context>
chip_gen: v7x
topology: tpu7x:2x2x1
jax: 0.10.0
libtpu: 0.0.40
codegen_flags: <defaults>
</compile_context>

<pallas_src>
import functools

import jax
import jax.numpy as jnp
from jax.experimental import pallas as pl
from jax.experimental.pallas import tpu as pltpu

_EPS = 1e-5


def _round_up8(n):
    return ((n + 7) // 8) * 8


def _store_with_halo(apad_ref, a_cd, L, C, d, pad, compute_dtype):
    """Write (L, C) activation at 8-aligned sublane offset `pad`, d-row zero halos."""
    halo = jnp.zeros((d, C), compute_dtype)
    apad_ref[pad - d:pad, :] = halo                 # front halo (tiny)
    apad_ref[pad + L:pad + L + d, :] = halo         # back halo (tiny)
    apad_ref[pad:pad + L, :] = a_cd                 # 8-aligned -> unmasked vst


def _conv3(a_cd, apad_ref, w_ref, L, C, d, pad):
    """k=3 conv as three accumulating MXU matmuls (no im2col concat slab).

    a_cd:     (L, C) activation in compute dtype (already resident in
              apad_ref[pad:pad+L], halos zeroed).
    apad_ref: (pad + L + d, C) zero-halo VMEM scratch.
    w_ref:    (3*C, Cout) tap-major weights ([w(x[l-d]); w(x[l]); w(x[l+d])]).
    Returns (L, Cout) float32 (MXU accumulates in f32; on v7x in-place in MRB).
    """
    y = jnp.dot(a_cd, w_ref[C:2 * C, :], preferred_element_type=jnp.float32)
    y = y + jnp.dot(apad_ref[pad - d:pad - d + L, :], w_ref[0:C, :],
                    preferred_element_type=jnp.float32)
    y = y + jnp.dot(apad_ref[pad + d:pad + d + L, :], w_ref[2 * C:3 * C, :],
                    preferred_element_type=jnp.float32)
    return y


def _bn2_stats_kernel(x_ref, s1_ref, t1_ref, w1_ref,
                      sum_ref, ssq_ref, apad_ref,
                      *, dilation, pad1, compute_dtype):
    """relu(scale1*x + shift1) -> dilated k=3 conv1; emit per-batch BN2 partials."""
    _, L, C = x_ref.shape
    d = dilation

    x = x_ref[0]                                        # (L, C) f32
    a1 = jnp.maximum(x * s1_ref[...].reshape(1, C)
                     + t1_ref[...].reshape(1, C), 0.0)  # BN1 + ReLU in f32 (VPU)
    a1c = a1.astype(compute_dtype)
    _store_with_halo(apad_ref, a1c, L, C, d, pad1, compute_dtype)
    y1 = _conv3(a1c, apad_ref, w1_ref, L, C, d, pad1)   # (L, C) f32

    sum_ref[...] = jnp.sum(y1, axis=0).reshape(1, 1, C)
    ssq_ref[...] = jnp.sum(y1 * y1, axis=0).reshape(1, 1, C)


def _fused_block_kernel(x_ref, s1_ref, t1_ref, w1_ref, s2_ref, t2_ref, w2_ref,
                        o_ref, apad1_ref, apad2_ref,
                        *, dilation, pad1, compute_dtype):
    """Recompute relu(bn1)->conv1 in VMEM, then relu(bn2)->conv2 -> + skip."""
    _, L, C = x_ref.shape
    d = dilation

    x = x_ref[0]                                        # (L, C) f32
    a1 = jnp.maximum(x * s1_ref[...].reshape(1, C)
                     + t1_ref[...].reshape(1, C), 0.0)
    a1c = a1.astype(compute_dtype)
    _store_with_halo(apad1_ref, a1c, L, C, d, pad1, compute_dtype)
    y1 = _conv3(a1c, apad1_ref, w1_ref, L, C, d, pad1)  # conv1 output, f32

    a2 = jnp.maximum(y1 * s2_ref[...].reshape(1, C)
                     + t2_ref[...].reshape(1, C), 0.0)
    a2c = a2.astype(compute_dtype)
    _store_with_halo(apad2_ref, a2c, L, C, 1, 8, compute_dtype)
    y2 = _conv3(a2c, apad2_ref, w2_ref, L, C, 1, 8)     # conv2 output, f32

    o_ref[...] = (y2.reshape(1, L, C) + x_ref[...]).astype(o_ref.dtype)


def _compiler_params(est_bytes):
    # Generation-aware VMEM cap: ~75% of physical capacity (96 MiB on v5e/v6e,
    # 48 MiB on v7x).  Fall back to the conservative v7x figure if the query
    # is unavailable.
    cap = 64 * 1024 * 1024
    try:
        info = pltpu.get_tpu_info()
        cap = int(getattr(info, "vmem_capacity_bytes", cap) or cap)
    except Exception:
        pass
    limit = int(min(max(est_bytes, 32 * 1024 * 1024), int(0.75 * cap)))
    return pltpu.CompilerParams(
        dimension_semantics=("parallel",),   # megacore-split the batch grid
        vmem_limit_bytes=limit,
    )


@functools.partial(jax.jit, static_argnames=("dilation", "compute_dtype"))
def residual_block_nlc(x_nlc, params, *, dilation, compute_dtype=jnp.bfloat16):
    """Primary API. x_nlc: (B, L, C). params: g1,b1,g2,b2 (C,), w1,w2 (3*C, C)."""
    B, L, C = x_nlc.shape
    w1 = params["w1"].astype(compute_dtype)
    w2 = params["w2"].astype(compute_dtype)
    assert w1.shape == (3 * C, C) and w2.shape == (3 * C, C), \
        "identity skip requires in_channels == out_channels"

    d = int(dilation)
    pad1 = max(8, _round_up8(d))             # 8-aligned data offset in scratch
    x32 = x_nlc.astype(jnp.float32)
    n = B * L

    # --- BN1 batch stats: single-pass E[x], E[x^2] (one XLA read of x). ---
    s1 = jnp.sum(x32, axis=(0, 1))
    q1 = jnp.sum(x32 * x32, axis=(0, 1))
    mean1 = s1 / n
    var1 = jnp.maximum(q1 / n - mean1 * mean1, 0.0)
    rstd1 = jax.lax.rsqrt(var1 + _EPS)
    scale1 = (params["g1"] * rstd1).reshape(1, 1, C).astype(jnp.float32)
    shift1 = (params["b1"] - mean1 * params["g1"] * rstd1
              ).reshape(1, 1, C).astype(jnp.float32)

    big_spec = pl.BlockSpec((1, L, C), lambda b: (b, 0, 0))
    vec_spec = pl.BlockSpec((1, 1, C), lambda b: (0, 0, 0))
    w_spec = pl.BlockSpec((3 * C, C), lambda b: (0, 0))
    part_spec = pl.BlockSpec((1, 1, C), lambda b: (b, 0, 0))

    cb = jnp.dtype(compute_dtype).itemsize
    est = (8 * L * C * 4                               # streamed tiles + live f32 intermediates
           + (pad1 + L + d) * C * cb + (9 + L) * C * cb  # halo scratches
           + 4 * 3 * C * C * cb                        # weights (double-buffered)
           + (1 << 20))                                # scalars / headroom
    cparams = _compiler_params(est)

    # --- Kernel A: BN2 partial stats only (no (B,L,C) intermediate in HBM). ---
    psum, pssq = pl.pallas_call(
        functools.partial(_bn2_stats_kernel, dilation=d, pad1=pad1,
                          compute_dtype=compute_dtype),
        grid=(B,),
        in_specs=[big_spec, vec_spec, vec_spec, w_spec],
        out_specs=(part_spec, part_spec),
        out_shape=(jax.ShapeDtypeStruct((B, 1, C), jnp.float32),
                   jax.ShapeDtypeStruct((B, 1, C), jnp.float32)),
        scratch_shapes=[pltpu.VMEM((pad1 + L + d, C), compute_dtype)],
        compiler_params=cparams,
    )(x32, scale1, shift1, w1)

    # --- BN2 batch stats from the tiny per-batch partials. ---
    s2 = jnp.sum(psum, axis=(0, 1))
    q2 = jnp.sum(pssq, axis=(0, 1))
    mean2 = s2 / n
    var2 = jnp.maximum(q2 / n - mean2 * mean2, 0.0)
    rstd2 = jax.lax.rsqrt(var2 + _EPS)
    scale2 = (params["g2"] * rstd2).reshape(1, 1, C).astype(jnp.float32)
    shift2 = (params["b2"] - mean2 * params["g2"] * rstd2
              ).reshape(1, 1, C).astype(jnp.float32)

    # --- Kernel B: recompute conv1 in VMEM, then bn2 -> conv2 -> + skip. ---
    out = pl.pallas_call(
        functools.partial(_fused_block_kernel, dilation=d, pad1=pad1,
                          compute_dtype=compute_dtype),
        grid=(B,),
        in_specs=[big_spec, vec_spec, vec_spec, w_spec,
                  vec_spec, vec_spec, w_spec],
        out_specs=big_spec,
        out_shape=jax.ShapeDtypeStruct((B, L, C), jnp.float32),
        scratch_shapes=[pltpu.VMEM((pad1 + L + d, C), compute_dtype),
                        pltpu.VMEM((9 + L, C), compute_dtype)],
        compiler_params=cparams,
    )(x32, scale1, shift1, w1, scale2, shift2, w2)
    return out


@functools.partial(jax.jit, static_argnames=("dilation", "compute_dtype"))
def residual_block_ncl(x_ncl, params, *, dilation, compute_dtype=jnp.bfloat16):
    """PyTorch-layout (B, C, L) parity wrapper.  A full ProtCNN stack should
    keep activations NLC end-to-end and call residual_block_nlc directly: the
    transposes here are full HBM passes that rival the kernel itself."""
    x_nlc = jnp.transpose(x_ncl, (0, 2, 1))
    out_nlc = residual_block_nlc(x_nlc, params, dilation=dilation,
                                 compute_dtype=compute_dtype)
    return jnp.transpose(out_nlc, (0, 2, 1))


def _reference_forward(x, g1, b1, w1_oih, g2, b2, w2_oih, dilation, eps=_EPS):
    """Pure-JAX reference in PyTorch NCL layout (XLA conv)."""
    def bn_relu(v, g, b):
        m = jnp.mean(v, axis=(0, 2), keepdims=True)
        var = jnp.mean((v - m) ** 2, axis=(0, 2), keepdims=True)
        y = ((v - m) * jax.lax.rsqrt(var + eps) * g.reshape(1, -1, 1)
             + b.reshape(1, -1, 1))
        return jnp.maximum(y, 0.0)

    def conv(v, w_oih, d):
        return jax.lax.conv_general_dilated(
            v, w_oih, window_strides=(1,), padding=[(d, d)], rhs_dilation=(d,),
            dimension_numbers=("NCH", "OIH", "NCH"))

    a1 = bn_relu(x, g1, b1)
    x1 = conv(a1, w1_oih, dilation)
    a2 = bn_relu(x1, g2, b2)
    return conv(a2, w2_oih, 1) + x


def _run_case(key, B, C, L, dilation, check_ncl=False):
    ks = jax.random.split(key, 7)
    x = jax.random.normal(ks[0], (B, C, L), jnp.float32)
    # Conv weights in PyTorch OIH layout (Cout, Cin, 3), deterministic init.
    w1_oih = 0.2 * jax.random.normal(ks[1], (C, C, 3), jnp.float32)
    w2_oih = 0.2 * jax.random.normal(ks[2], (C, C, 3), jnp.float32)
    g1 = 1.0 + 0.1 * jax.random.normal(ks[3], (C,), jnp.float32)
    b1 = 0.1 * jax.random.normal(ks[4], (C,), jnp.float32)
    g2 = 1.0 + 0.1 * jax.random.normal(ks[5], (C,), jnp.float32)
    b2 = 0.1 * jax.random.normal(ks[6], (C,), jnp.float32)
    params = {
        "g1": g1, "b1": b1, "g2": g2, "b2": b2,
        # Kernel expects tap-major flattened weights: OIH -> (K, I, O) -> (3*C, C).
        "w1": jnp.transpose(w1_oih, (2, 1, 0)).reshape(3 * C, C),
        "w2": jnp.transpose(w2_oih, (2, 1, 0)).reshape(3 * C, C),
    }

    ref_ncl = _reference_forward(x, g1, b1, w1_oih, g2, b2, w2_oih, dilation)
    ref_nlc = jnp.transpose(ref_ncl, (0, 2, 1))
    x_nlc = jnp.transpose(x, (0, 2, 1))

    # f32 matmul operands: tight comparison.
    out_f32 = jax.block_until_ready(
        residual_block_nlc(x_nlc, params, dilation=dilation,
                           compute_dtype=jnp.float32))
    assert out_f32.shape == (B, L, C)
    assert jnp.allclose(out_f32, ref_nlc, atol=2e-3, rtol=2e-3), \
        "f32 kernel mismatch"

    # bf16 MXU operands (the default), f32 accumulate: relative-Linf check.
    out_bf = jax.block_until_ready(
        residual_block_nlc(x_nlc, params, dilation=dilation))
    rel = jnp.max(jnp.abs(out_bf - ref_nlc)) / (jnp.max(jnp.abs(ref_nlc)) + 1e-6)
    assert float(rel) < 5e-2, f"bf16 kernel mismatch (rel={float(rel)})"

    if check_ncl:
        out_ncl = jax.block_until_ready(
            residual_block_ncl(x, params, dilation=dilation,
                               compute_dtype=jnp.float32))
        assert out_ncl.shape == (B, C, L)
        assert jnp.allclose(out_ncl, ref_ncl, atol=2e-3, rtol=2e-3), \
            "NCL wrapper mismatch"


if __name__ == "__main__":
    k1, k2, k3 = jax.random.split(jax.random.PRNGKey(0), 3)
    _run_case(k1, B=2, C=4, L=16, dilation=2, check_ncl=True)   # tiny
    _run_case(k2, B=2, C=8, L=24, dilation=3)                   # odd dilation
    _run_case(k3, B=4, C=128, L=64, dilation=2)                 # full-lane tiles
    print("KERNEL_OK")
</pallas_src>

<mosaic_0001>
module attributes {stable_mosaic.version = 11 : i64} {
  func.func @_bn2_stats_kernel(%arg0: i32, %arg1: memref<1x16x4xf32, #tpu.memory_space<vmem>>, %arg2: memref<1x1x4xf32, #tpu.memory_space<vmem>>, %arg3: memref<1x1x4xf32, #tpu.memory_space<vmem>>, %arg4: memref<12x4xf32, #tpu.memory_space<vmem>>, %arg5: memref<1x1x4xf32, #tpu.memory_space<vmem>>, %arg6: memref<1x1x4xf32, #tpu.memory_space<vmem>>, %arg7: memref<26x4xf32, #tpu.memory_space<vmem>>) attributes {dimension_semantics = [#tpu.dimension_semantics<parallel>], iteration_bounds = array<i64: 2>, scalar_prefetch = 0 : i64, scratch_operands = 1 : i64, tpu.core_type = #tpu.core_type<tc>, window_params = [{transform_indices = @transform_0, window_bounds = array<i64: 1, 16, 4>}, {pipeline_mode = #tpu.pipeline_mode<synchronous>, transform_indices = @transform_1, window_bounds = array<i64: 1, 1, 4>}, {pipeline_mode = #tpu.pipeline_mode<synchronous>, transform_indices = @transform_2, window_bounds = array<i64: 1, 1, 4>}, {pipeline_mode = #tpu.pipeline_mode<synchronous>, transform_indices = @transform_3, window_bounds = array<i64: 12, 4>}, {transform_indices = @transform_4, window_bounds = array<i64: 1, 1, 4>}, {transform_indices = @transform_5, window_bounds = array<i64: 1, 1, 4>}]} {
    %c0 = arith.constant 0 : index
    %c0_0 = arith.constant 0 : index
    %c0_1 = arith.constant 0 : index
    %0 = vector.load %arg1[%c0, %c0_0, %c0_1] : memref<1x16x4xf32, #tpu.memory_space<vmem>>, vector<1x16x4xf32>
    %1 = vector.shape_cast %0 : vector<1x16x4xf32> to vector<16x4xf32>
    %c0_2 = arith.constant 0 : index
    %c0_3 = arith.constant 0 : index
    %c0_4 = arith.constant 0 : index
    %2 = vector.load %arg2[%c0_2, %c0_3, %c0_4] : memref<1x1x4xf32, #tpu.memory_space<vmem>>, vector<1x1x4xf32>
    %3 = vector.shape_cast %2 : vector<1x1x4xf32> to vector<1x4xf32>
    %4 = vector.broadcast %3 : vector<1x4xf32> to vector<16x4xf32>
    %5 = arith.mulf %1, %4 : vector<16x4xf32>
    %c0_5 = arith.constant 0 : index
    %c0_6 = arith.constant 0 : index
    %c0_7 = arith.constant 0 : index
    %6 = vector.load %arg3[%c0_5, %c0_6, %c0_7] : memref<1x1x4xf32, #tpu.memory_space<vmem>>, vector<1x1x4xf32>
    %7 = vector.shape_cast %6 : vector<1x1x4xf32> to vector<1x4xf32>
    %8 = vector.broadcast %7 : vector<1x4xf32> to vector<16x4xf32>
    %9 = arith.addf %5, %8 : vector<16x4xf32>
    %cst = arith.constant 0.000000e+00 : f32
    %10 = vector.broadcast %cst : f32 to vector<16x4xf32>
    %11 = arith.maximumf %9, %10 : vector<16x4xf32>
    %cst_8 = arith.constant 0.000000e+00 : f32
    %12 = vector.broadcast %cst_8 : f32 to vector<2x4xf32>
    %c6 = arith.constant 6 : index
    %c0_9 = arith.constant 0 : index
    %13 = vector.load %arg7[%c6, %c0_9] : memref<26x4xf32, #tpu.memory_space<vmem>>, vector<2x4xf32>
    tpu.vector_store %arg7[%c6, %c0_9], %12 {strides = array<i32>} : memref<26x4xf32, #tpu.memory_space<vmem>>, vector<2x4xf32>,
    %c24 = arith.constant 24 : index
    %c0_10 = arith.constant 0 : index
    %14 = vector.load %arg7[%c24, %c0_10] : memref<26x4xf32, #tpu.memory_space<vmem>>, vector<2x4xf32>
    tpu.vector_store %arg7[%c24, %c0_10], %12 {strides = array<i32>} : memref<26x4xf32, #tpu.memory_space<vmem>>, vector<2x4xf32>,
    %c8 = arith.constant 8 : index
    %c0_11 = arith.constant 0 : index
    %15 = vector.load %arg7[%c8, %c0_11] : memref<26x4xf32, #tpu.memory_space<vmem>>, vector<16x4xf32>
    tpu.vector_store %arg7[%c8, %c0_11], %11 {strides = array<i32>} : memref<26x4xf32, #tpu.memory_space<vmem>>, vector<16x4xf32>,
    %c4 = arith.constant 4 : index
    %c0_12 = arith.constant 0 : index
    %16 = vector.load %arg4[%c4, %c0_12] : memref<12x4xf32, #tpu.memory_space<vmem>>, vector<4x4xf32>
    %cst_13 = arith.constant dense<0.000000e+00> : vector<16x4xf32>
    %17 = tpu.matmul %11, %16, %cst_13 {dimension_numbers = #tpu.dot_dimension_numbers<[1], [0], [0], [1], [0, 0, 1, 1], [], []>} : vector<16x4xf32>, vector<4x4xf32>, vector<16x4xf32> -> vector<16x4xf32>
    %c6_14 = arith.constant 6 : index
    %c0_15 = arith.constant 0 : index
    %18 = vector.load %arg7[%c6_14, %c0_15] : memref<26x4xf32, #tpu.memory_space<vmem>>, vector<16x4xf32>
    %c0_16 = arith.constant 0 : index
    %c0_17 = arith.constant 0 : index
    %19 = vector.load %arg4[%c0_16, %c0_17] : memref<12x4xf32, #tpu.memory_space<vmem>>, vector<4x4xf32>
    %cst_18 = arith.constant dense<0.000000e+00> : vector<16x4xf32>
    %20 = tpu.matmul %18, %19, %cst_18 {dimension_numbers = #tpu.dot_dimension_numbers<[1], [0], [0], [1], [0, 0, 1, 1], [], []>} : vector<16x4xf32>, vector<4x4xf32>, vector<16x4xf32> -> vector<16x4xf32>
    %21 = arith.addf %17, %20 : vector<16x4xf32>
    %c10 = arith.constant 10 : index
    %c0_19 = arith.constant 0 : index
    %22 = vector.load %arg7[%c10, %c0_19] : memref<26x4xf32, #tpu.memory_space<vmem>>, vector<16x4xf32>
    %c8_20 = arith.constant 8 : index
    %c0_21 = arith.constant 0 : index
    %23 = vector.load %arg4[%c8_20, %c0_21] : memref<12x4xf32, #tpu.memory_space<vmem>>, vector<4x4xf32>
    %cst_22 = arith.constant dense<0.000000e+00> : vector<16x4xf32>
    %24 = tpu.matmul %22, %23, %cst_22 {dimension_numbers = #tpu.dot_dimension_numbers<[1], [0], [0], [1], [0, 0, 1, 1], [], []>} : vector<16x4xf32>, vector<4x4xf32>, vector<16x4xf32> -> vector<16x4xf32>
    %25 = arith.addf %21, %24 : vector<16x4xf32>
    %cst_23 = arith.constant dense<0.000000e+00> : vector<4xf32>
    %26 = vector.multi_reduction <add>, %25, %cst_23 [0] : vector<16x4xf32> to vector<4xf32>
    %27 = vector.shape_cast %26 : vector<4xf32> to vector<1x1x4xf32>
    %c0_24 = arith.constant 0 : index
    %c0_25 = arith.constant 0 : index
    %c0_26 = arith.constant 0 : index
    %28 = vector.load %arg5[%c0_24, %c0_25, %c0_26] : memref<1x1x4xf32, #tpu.memory_space<vmem>>, vector<1x1x4xf32>
    tpu.vector_store %arg5[%c0_24, %c0_25, %c0_26], %27 {strides = array<i32>} : memref<1x1x4xf32, #tpu.memory_space<vmem>>, vector<1x1x4xf32>,
    %29 = arith.mulf %25, %25 : vector<16x4xf32>
    %cst_27 = arith.constant dense<0.000000e+00> : vector<4xf32>
    %30 = vector.multi_reduction <add>, %29, %cst_27 [0] : vector<16x4xf32> to vector<4xf32>
    %31 = vector.shape_cast %30 : vector<4xf32> to vector<1x1x4xf32>
    %c0_28 = arith.constant 0 : index
    %c0_29 = arith.constant 0 : index
    %c0_30 = arith.constant 0 : index
    %32 = vector.load %arg6[%c0_28, %c0_29, %c0_30] : memref<1x1x4xf32, #tpu.memory_space<vmem>>, vector<1x1x4xf32>
    tpu.vector_store %arg6[%c0_28, %c0_29, %c0_30], %31 {strides = array<i32>} : memref<1x1x4xf32, #tpu.memory_space<vmem>>, vector<1x1x4xf32>,
    return
  }
  func.func @transform_0(%arg0: i32) -> (i32, i32, i32) {
    %c0_i32 = arith.constant 0 : i32
    %c0_i32_0 = arith.constant 0 : i32
    %c0_i32_1 = arith.constant 0 : i32
    return %arg0, %c0_i32, %c0_i32_0 : i32, i32, i32
  }
  func.func @transform_1(%arg0: i32) -> (i32, i32, i32) {
    %c0_i32 = arith.constant 0 : i32
    %c0_i32_0 = arith.constant 0 : i32
    %c0_i32_1 = arith.constant 0 : i32
    %c0_i32_2 = arith.constant 0 : i32
    return %c0_i32, %c0_i32_0, %c0_i32_1 : i32, i32, i32
  }
  func.func @transform_2(%arg0: i32) -> (i32, i32, i32) {
    %c0_i32 = arith.constant 0 : i32
    %c0_i32_0 = arith.constant 0 : i32
    %c0_i32_1 = arith.constant 0 : i32
    %c0_i32_2 = arith.constant 0 : i32
    return %c0_i32, %c0_i32_0, %c0_i32_1 : i32, i32, i32
  }
  func.func @transform_3(%arg0: i32) -> (i32, i32) {
    %c0_i32 = arith.constant 0 : i32
    %c0_i32_0 = arith.constant 0 : i32
    %c0_i32_1 = arith.constant 0 : i32
    return %c0_i32, %c0_i32_0 : i32, i32
  }
  func.func @transform_4(%arg0: i32) -> (i32, i32, i32) {
    %c0_i32 = arith.constant 0 : i32
    %c0_i32_0 = arith.constant 0 : i32
    %c0_i32_1 = arith.constant 0 : i32
    return %arg0, %c0_i32, %c0_i32_0 : i32, i32, i32
  }
  func.func @transform_5(%arg0: i32) -> (i32, i32, i32) {
    %c0_i32 = arith.constant 0 : i32
    %c0_i32_0 = arith.constant 0 : i32
    %c0_i32_1 = arith.constant 0 : i32
    return %arg0, %c0_i32, %c0_i32_0 : i32, i32, i32
  }
}

module attributes {stable_mosaic.version = 11 : i64} {
  func.func @_fused_block_kernel(%arg0: i32, %arg1: memref<1x16x4xf32, #tpu.memory_space<vmem>>, %arg2: memref<1x1x4xf32, #tpu.memory_space<vmem>>, %arg3: memref<1x1x4xf32, #tpu.memory_space<vmem>>, %arg4: memref<12x4xf32, #tpu.memory_space<vmem>>, %arg5: memref<1x1x4xf32, #tpu.memory_space<vmem>>, %arg6: memref<1x1x4xf32, #tpu.memory_space<vmem>>, %arg7: memref<12x4xf32, #tpu.memory_space<vmem>>, %arg8: memref<1x16x4xf32, #tpu.memory_space<vmem>>, %arg9: memref<26x4xf32, #tpu.memory_space<vmem>>, %arg10: memref<25x4xf32, #tpu.memory_space<vmem>>) attributes {dimension_semantics = [#tpu.dimension_semantics<parallel>], iteration_bounds = array<i64: 2>, scalar_prefetch = 0 : i64, scratch_operands = 2 : i64, tpu.core_type = #tpu.core_type<tc>, window_params = [{transform_indices = @transform_0, window_bounds = array<i64: 1, 16, 4>}, {pipeline_mode = #tpu.pipeline_mode<synchronous>, transform_indices = @transform_1, window_bounds = array<i64: 1, 1, 4>}, {pipeline_mode = #tpu.pipeline_mode<synchronous>, transform_indices = @transform_2, window_bounds = array<i64: 1, 1, 4>}, {pipeline_mode = #tpu.pipeline_mode<synchronous>, transform_indices = @transform_3, window_bounds = array<i64: 12, 4>}, {pipeline_mode = #tpu.pipeline_mode<synchronous>, transform_indices = @transform_4, window_bounds = array<i64: 1, 1, 4>}, {pipeline_mode = #tpu.pipeline_mode<synchronous>, transform_indices = @transform_5, window_bounds = array<i64: 1, 1, 4>}, {pipeline_mode = #tpu.pipeline_mode<synchronous>, transform_indices = @transform_6, window_bounds = array<i64: 12, 4>}, {transform_indices = @transform_7, window_bounds = array<i64: 1, 16, 4>}]} {
    %c0 = arith.constant 0 : index
    %c0_0 = arith.constant 0 : index
    %c0_1 = arith.constant 0 : index
    %0 = vector.load %arg1[%c0, %c0_0, %c0_1] : memref<1x16x4xf32, #tpu.memory_space<vmem>>, vector<1x16x4xf32>
    %1 = vector.shape_cast %0 : vector<1x16x4xf32> to vector<16x4xf32>
    %c0_2 = arith.constant 0 : index
    %c0_3 = arith.constant 0 : index
    %c0_4 = arith.constant 0 : index
    %2 = vector.load %arg2[%c0_2, %c0_3, %c0_4] : memref<1x1x4xf32, #tpu.memory_space<vmem>>, vector<1x1x4xf32>
    %3 = vector.shape_cast %2 : vector<1x1x4xf32> to vector<1x4xf32>
    %4 = vector.broadcast %3 : vector<1x4xf32> to vector<16x4xf32>
    %5 = arith.mulf %1, %4 : vector<16x4xf32>
    %c0_5 = arith.constant 0 : index
    %c0_6 = arith.constant 0 : index
    %c0_7 = arith.constant 0 : index
    %6 = vector.load %arg3[%c0_5, %c0_6, %c0_7] : memref<1x1x4xf32, #tpu.memory_space<vmem>>, vector<1x1x4xf32>
    %7 = vector.shape_cast %6 : vector<1x1x4xf32> to vector<1x4xf32>
    %8 = vector.broadcast %7 : vector<1x4xf32> to vector<16x4xf32>
    %9 = arith.addf %5, %8 : vector<16x4xf32>
    %cst = arith.constant 0.000000e+00 : f32
    %10 = vector.broadcast %cst : f32 to vector<16x4xf32>
    %11 = arith.maximumf %9, %10 : vector<16x4xf32>
    %cst_8 = arith.constant 0.000000e+00 : f32
    %12 = vector.broadcast %cst_8 : f32 to vector<2x4xf32>
    %c6 = arith.constant 6 : index
    %c0_9 = arith.constant 0 : index
    %13 = vector.load %arg9[%c6, %c0_9] : memref<26x4xf32, #tpu.memory_space<vmem>>, vector<2x4xf32>
    tpu.vector_store %arg9[%c6, %c0_9], %12 {strides = array<i32>} : memref<26x4xf32, #tpu.memory_space<vmem>>, vector<2x4xf32>,
    %c24 = arith.constant 24 : index
    %c0_10 = arith.constant 0 : index
    %14 = vector.load %arg9[%c24, %c0_10] : memref<26x4xf32, #tpu.memory_space<vmem>>, vector<2x4xf32>
    tpu.vector_store %arg9[%c24, %c0_10], %12 {strides = array<i32>} : memref<26x4xf32, #tpu.memory_space<vmem>>, vector<2x4xf32>,
    %c8 = arith.constant 8 : index
    %c0_11 = arith.constant 0 : index
    %15 = vector.load %arg9[%c8, %c0_11] : memref<26x4xf32, #tpu.memory_space<vmem>>, vector<16x4xf32>
    tpu.vector_store %arg9[%c8, %c0_11], %11 {strides = array<i32>} : memref<26x4xf32, #tpu.memory_space<vmem>>, vector<16x4xf32>,
    %c4 = arith.constant 4 : index
    %c0_12 = arith.constant 0 : index
    %16 = vector.load %arg4[%c4, %c0_12] : memref<12x4xf32, #tpu.memory_space<vmem>>, vector<4x4xf32>
    %cst_13 = arith.constant dense<0.000000e+00> : vector<16x4xf32>
    %17 = tpu.matmul %11, %16, %cst_13 {dimension_numbers = #tpu.dot_dimension_numbers<[1], [0], [0], [1], [0, 0, 1, 1], [], []>} : vector<16x4xf32>, vector<4x4xf32>, vector<16x4xf32> -> vector<16x4xf32>
    %c6_14 = arith.constant 6 : index
    %c0_15 = arith.constant 0 : index
    %18 = vector.load %arg9[%c6_14, %c0_15] : memref<26x4xf32, #tpu.memory_space<vmem>>, vector<16x4xf32>
    %c0_16 = arith.constant 0 : index
    %c0_17 = arith.constant 0 : index
    %19 = vector.load %arg4[%c0_16, %c0_17] : memref<12x4xf32, #tpu.memory_space<vmem>>, vector<4x4xf32>
    %cst_18 = arith.constant dense<0.000000e+00> : vector<16x4xf32>
    %20 = tpu.matmul %18, %19, %cst_18 {dimension_numbers = #tpu.dot_dimension_numbers<[1], [0], [0], [1], [0, 0, 1, 1], [], []>} : vector<16x4xf32>, vector<4x4xf32>, vector<16x4xf32> -> vector<16x4xf32>
    %21 = arith.addf %17, %20 : vector<16x4xf32>
    %c10 = arith.constant 10 : index
    %c0_19 = arith.constant 0 : index
    %22 = vector.load %arg9[%c10, %c0_19] : memref<26x4xf32, #tpu.memory_space<vmem>>, vector<16x4xf32>
    %c8_20 = arith.constant 8 : index
    %c0_21 = arith.constant 0 : index
    %23 = vector.load %arg4[%c8_20, %c0_21] : memref<12x4xf32, #tpu.memory_space<vmem>>, vector<4x4xf32>
    %cst_22 = arith.constant dense<0.000000e+00> : vector<16x4xf32>
    %24 = tpu.matmul %22, %23, %cst_22 {dimension_numbers = #tpu.dot_dimension_numbers<[1], [0], [0], [1], [0, 0, 1, 1], [], []>} : vector<16x4xf32>, vector<4x4xf32>, vector<16x4xf32> -> vector<16x4xf32>
    %25 = arith.addf %21, %24 : vector<16x4xf32>
    %c0_23 = arith.constant 0 : index
    %c0_24 = arith.constant 0 : index
    %c0_25 = arith.constant 0 : index
    %26 = vector.load %arg5[%c0_23, %c0_24, %c0_25] : memref<1x1x4xf32, #tpu.memory_space<vmem>>, vector<1x1x4xf32>
    %27 = vector.shape_cast %26 : vector<1x1x4xf32> to vector<1x4xf32>
    %28 = vector.broadcast %27 : vector<1x4xf32> to vector<16x4xf32>
    %29 = arith.mulf %25, %28 : vector<16x4xf32>
    %c0_26 = arith.constant 0 : index
    %c0_27 = arith.constant 0 : index
    %c0_28 = arith.constant 0 : index
    %30 = vector.load %arg6[%c0_26, %c0_27, %c0_28] : memref<1x1x4xf32, #tpu.memory_space<vmem>>, vector<1x1x4xf32>
    %31 = vector.shape_cast %30 : vector<1x1x4xf32> to vector<1x4xf32>
    %32 = vector.broadcast %31 : vector<1x4xf32> to vector<16x4xf32>
    %33 = arith.addf %29, %32 : vector<16x4xf32>
    %cst_29 = arith.constant 0.000000e+00 : f32
    %34 = vector.broadcast %cst_29 : f32 to vector<16x4xf32>
    %35 = arith.maximumf %33, %34 : vector<16x4xf32>
    %cst_30 = arith.constant 0.000000e+00 : f32
    %36 = vector.broadcast %cst_30 : f32 to vector<1x4xf32>
    %c7 = arith.constant 7 : index
    %c0_31 = arith.constant 0 : index
    %37 = vector.load %arg10[%c7, %c0_31] : memref<25x4xf32, #tpu.memory_space<vmem>>, vector<1x4xf32>
    tpu.vector_store %arg10[%c7, %c0_31], %36 {strides = array<i32>} : memref<25x4xf32, #tpu.memory_space<vmem>>, vector<1x4xf32>,
    %c24_32 = arith.constant 24 : index
    %c0_33 = arith.constant 0 : index
    %38 = vector.load %arg10[%c24_32, %c0_33] : memref<25x4xf32, #tpu.memory_space<vmem>>, vector<1x4xf32>
    tpu.vector_store %arg10[%c24_32, %c0_33], %36 {strides = array<i32>} : memref<25x4xf32, #tpu.memory_space<vmem>>, vector<1x4xf32>,
    %c8_34 = arith.constant 8 : index
    %c0_35 = arith.constant 0 : index
    %39 = vector.load %arg10[%c8_34, %c0_35] : memref<25x4xf32, #tpu.memory_space<vmem>>, vector<16x4xf32>
    tpu.vector_store %arg10[%c8_34, %c0_35], %35 {strides = array<i32>} : memref<25x4xf32, #tpu.memory_space<vmem>>, vector<16x4xf32>,
    %c4_36 = arith.constant 4 : index
    %c0_37 = arith.constant 0 : index
    %40 = vector.load %arg7[%c4_36, %c0_37] : memref<12x4xf32, #tpu.memory_space<vmem>>, vector<4x4xf32>
    %cst_38 = arith.constant dense<0.000000e+00> : vector<16x4xf32>
    %41 = tpu.matmul %35, %40, %cst_38 {dimension_numbers = #tpu.dot_dimension_numbers<[1], [0], [0], [1], [0, 0, 1, 1], [], []>} : vector<16x4xf32>, vector<4x4xf32>, vector<16x4xf32> -> vector<16x4xf32>
    %c7_39 = arith.constant 7 : index
    %c0_40 = arith.constant 0 : index
    %42 = vector.load %arg10[%c7_39, %c0_40] : memref<25x4xf32, #tpu.memory_space<vmem>>, vector<16x4xf32>
    %c0_41 = arith.constant 0 : index
    %c0_42 = arith.constant 0 : index
    %43 = vector.load %arg7[%c0_41, %c0_42] : memref<12x4xf32, #tpu.memory_space<vmem>>, vector<4x4xf32>
    %cst_43 = arith.constant dense<0.000000e+00> : vector<16x4xf32>
    %44 = tpu.matmul %42, %43, %cst_43 {dimension_numbers = #tpu.dot_dimension_numbers<[1], [0], [0], [1], [0, 0, 1, 1], [], []>} : vector<16x4xf32>, vector<4x4xf32>, vector<16x4xf32> -> vector<16x4xf32>
    %45 = arith.addf %41, %44 : vector<16x4xf32>
    %c9 = arith.constant 9 : index
    %c0_44 = arith.constant 0 : index
    %46 = vector.load %arg10[%c9, %c0_44] : memref<25x4xf32, #tpu.memory_space<vmem>>, vector<16x4xf32>
    %c8_45 = arith.constant 8 : index
    %c0_46 = arith.constant 0 : index
    %47 = vector.load %arg7[%c8_45, %c0_46] : memref<12x4xf32, #tpu.memory_space<vmem>>, vector<4x4xf32>
    %cst_47 = arith.constant dense<0.000000e+00> : vector<16x4xf32>
    %48 = tpu.matmul %46, %47, %cst_47 {dimension_numbers = #tpu.dot_dimension_numbers<[1], [0], [0], [1], [0, 0, 1, 1], [], []>} : vector<16x4xf32>, vector<4x4xf32>, vector<16x4xf32> -> vector<16x4xf32>
    %49 = arith.addf %45, %48 : vector<16x4xf32>
    %50 = vector.shape_cast %49 : vector<16x4xf32> to vector<1x16x4xf32>
    %c0_48 = arith.constant 0 : index
    %c0_49 = arith.constant 0 : index
    %c0_50 = arith.constant 0 : index
    %51 = vector.load %arg1[%c0_48, %c0_49, %c0_50] : memref<1x16x4xf32, #tpu.memory_space<vmem>>, vector<1x16x4xf32>
    %52 = arith.addf %50, %51 : vector<1x16x4xf32>
    %c0_51 = arith.constant 0 : index
    %c0_52 = arith.constant 0 : index
    %c0_53 = arith.constant 0 : index
    %53 = vector.load %arg8[%c0_51, %c0_52, %c0_53] : memref<1x16x4xf32, #tpu.memory_space<vmem>>, vector<1x16x4xf32>
    tpu.vector_store %arg8[%c0_51, %c0_52, %c0_53], %52 {strides = array<i32>} : memref<1x16x4xf32, #tpu.memory_space<vmem>>, vector<1x16x4xf32>,
    return
  }
  func.func @transform_0(%arg0: i32) -> (i32, i32, i32) {
    %c0_i32 = arith.constant 0 : i32
    %c0_i32_0 = arith.constant 0 : i32
    %c0_i32_1 = arith.constant 0 : i32
    return %arg0, %c0_i32, %c0_i32_0 : i32, i32, i32
  }
  func.func @transform_1(%arg0: i32) -> (i32, i32, i32) {
    %c0_i32 = arith.constant 0 : i32
    %c0_i32_0 = arith.constant 0 : i32
    %c0_i32_1 = arith.constant 0 : i32
    %c0_i32_2 = arith.constant 0 : i32
    return %c0_i32, %c0_i32_0, %c0_i32_1 : i32, i32, i32
  }
  func.func @transform_2(%arg0: i32) -> (i32, i32, i32) {
    %c0_i32 = arith.constant 0 : i32
    %c0_i32_0 = arith.constant 0 : i32
    %c0_i32_1 = arith.constant 0 : i32
    %c0_i32_2 = arith.constant 0 : i32
    return %c0_i32, %c0_i32_0, %c0_i32_1 : i32, i32, i32
  }
  func.func @transform_3(%arg0: i32) -> (i32, i32) {
    %c0_i32 = arith.constant 0 : i32
    %c0_i32_0 = arith.constant 0 : i32
    %c0_i32_1 = arith.constant 0 : i32
    return %c0_i32, %c0_i32_0 : i32, i32
  }
  func.func @transform_4(%arg0: i32) -> (i32, i32, i32) {
    %c0_i32 = arith.constant 0 : i32
    %c0_i32_0 = arith.constant 0 : i32
    %c0_i32_1 = arith.constant 0 : i32
    %c0_i32_2 = arith.constant 0 : i32
    return %c0_i32, %c0_i32_0, %c0_i32_1 : i32, i32, i32
  }
  func.func @transform_5(%arg0: i32) -> (i32, i32, i32) {
    %c0_i32 = arith.constant 0 : i32
    %c0_i32_0 = arith.constant 0 : i32
    %c0_i32_1 = arith.constant 0 : i32
    %c0_i32_2 = arith.constant 0 : i32
    return %c0_i32, %c0_i32_0, %c0_i32_1 : i32, i32, i32
  }
  func.func @transform_6(%arg0: i32) -> (i32, i32) {
    %c0_i32 = arith.constant 0 : i32
    %c0_i32_0 = arith.constant 0 : i32
    %c0_i32_1 = arith.constant 0 : i32
    return %c0_i32, %c0_i32_0 : i32, i32
  }
  func.func @transform_7(%arg0: i32) -> (i32, i32, i32) {
    %c0_i32 = arith.constant 0 : i32
    %c0_i32_0 = arith.constant 0 : i32
    %c0_i32_1 = arith.constant 0 : i32
    return %arg0, %c0_i32, %c0_i32_0 : i32, i32, i32
  }
}

</mosaic_0001>

<bundles_post_ra>
// kernel: residual_block_nlc.2
= control target key start
LH: loop header
LB: loop body
LE: loop exit
PB: predicated region body
PF: predicated region fallthrough
CT: control target
= control target key end

     0   :  { %s712_s18 = smov 0   ;;  %s770_s0 = inlined_call_operand.vmem [shape: f32[2,16,4], index: 0, kind: input, shape index: {}]   ;;  %s771_s1 = inlined_call_operand.vmem [shape: f32[1,1,4], index: 1, kind: input, shape index: {}]   ;;  %s772_s2 = inlined_call_operand.vmem [shape: f32[1,1,4], index: 2, kind: input, shape index: {}]   ;;  %s773_s3 = inlined_call_operand.vmem [shape: f32[12,4], index: 3, kind: input, shape index: {}]   ;;  %s774_s4 = inlined_call_operand.vmem [shape: f32[2,1,4], index: 4, kind: output, shape index: {0}]   ;;  %s775_s5 = inlined_call_operand.vmem [shape: f32[2,1,4], index: 5, kind: output, shape index: {1}]  }
   0x1 LB: > { %s615_s19 = sadd.s32 4294967295, %s679_s18   ;;  %p619_p0 = scmp.ge.s32.totalorder %s679_s18, 1  ;;  %s679_s18 = sphi %s712_s18, %s16_s18  }
   0x2   : > { %p190_p1 = scmp.lt.s32.totalorder %s679_s18, 3 }
   0x4   : > { %p191_p2 = pnand %p619_p0, %p190_p1 }
   0x5   : > { %v258_v0 = vld [vmem:[%s773_s3 + $0x4] sm:$0xf] (!%p191_p2)  ;;  %vm268_vm0 = vcmask (!%p191_p2), 1043456   ;;  %p219_p3 = scmp.lt.s32.totalorder (!%p191_p2), %s615_s19, 1  ;;  %v433_v1 = vld [vmem:[%s773_s3 + $0x8] sm:$0xf] (!%p191_p2) }
   0x6   : > { %194 = sbr.rel (%p191_p2) target bundleno = 266 (0x10a), region = 36  ;;  %650 = vmatprep.subr.msk.mxu0 (!%p191_p2), %vm268_vm0, %v258_v0  ;;  %vm252_vm1 = vcmask (!%p191_p2), 25600   ;;  %v261_v2 = vld [vmem:[%s773_s3] sm:$0xf] (!%p191_p2)  ;;  %v681_v3 = vmov (!%p191_p2), 0.0   ;;  %vm255_vm2 = vcmask (!%p191_p2), 31744  }
   0x7   : > { %651 = vmatpush3.msk.msra.mxu0 (!%p191_p2), %vm268_vm0, %v258_v0  ;;  %645 = vmatprep.subr.msk.mxu1 (!%p191_p2), %vm268_vm0, %v261_v2  ;;  %253 = vst.msk [vmem:[#allocation2 + $0x6] sm:$0x3] (!%p191_p2), %vm252_vm1, %v681_v3  ;;  %254 = vst.msk [vmem:[#allocation2 + $0x18] sm:$0x3] (!%p191_p2), %vm252_vm1, %v681_v3  ;;  %v622_v4 = vld [vmem:[%s771_s1] ss:$0 sm:$0xff] (!%p191_p2) }
   0x8   : > { %655 = vmatprep.subr.msk.mxu0 (!%p191_p2), %vm268_vm0, %v433_v1  ;;  %646 = vmatpush3.msk.msra.mxu1 (!%p191_p2), %vm268_vm0, %v261_v2  ;;  %v623_v7 = vld [vmem:[%s772_s2] ss:$0 sm:$0xff] (!%p191_p2)  ;;  %vm529_vm3 = vcmask (!%p191_p2), 24576  }
   0xd   : > { %s777_s19 = smov (!%p219_p3, %s615_s19), 1 }
   0xe   : > { %s635_s26 = sshll.u32 %s777_s19, 4  ;;  %s226_s11 = scalar_lea.vmem %s774_s4, %s777_s19 }
   0xf   : > { %s223_s6 = scalar_lea.vmem %s770_s0, %s635_s26  ;;  %s229_s14 = scalar_lea.vmem %s775_s5, %s777_s19 }
  0x10   : > { %v230_v5 = vld [vmem:[%s223_s6] sm:$0xff]  ;;  %v231_v6 = vld [vmem:[%s223_s6 + $0x8] sm:$0xff] }
  0x11   : > { %v239_v8 = vmul.f32 %v622_v4, %v230_v5  ;;  %v240_v9 = vmul.f32 %v622_v4, %v231_v6 }
  0x13   : > { %v248_v10 = vadd.f32 %v623_v7, %v239_v8  ;;  %v249_v11 = vadd.f32 %v623_v7, %v240_v9 }
  0x15   : > { %v250_v12 = vmax.f32 %v248_v10, 0.0  ;;  %v251_v13 = vmax.f32 %v249_v11, 0.0 }
  0x17   : > { %256 = vst.msk [vmem:[#allocation2 + $0x8] sm:$0xff] %vm255_vm2, %v250_v12  ;;  %257 = vst.msk [vmem:[#allocation2 + $0x10] sm:$0xff] %vm255_vm2, %v251_v13  ;;  %652 = vmatprep.mubr.msk.f32.mxu0 %vm255_vm2, %v250_v12 }
  0x18   : > { %653 = vmatmul.mubr.msk.f32.vlgmr.msra.gmra.mrb[0].mxu0 %vm255_vm2, %v251_v13 }
  0x19   : > { %656 = vmatpush3.msk.msra.mxu0 %vm268_vm0, %v433_v1 }
  0x1e   : > { %v259_v14 = vld [vmem:[#allocation2 + $0x6] sm:$0xff]  ;;  %v260_v16 = vld [vmem:[#allocation2 + $0xe] sm:$0xff] }
  0x1f   : > { %v431_v15 = vld [vmem:[#allocation2 + $0xa] sm:$0xff]  ;;  %647 = vmatprep.mubr.msk.f32.mxu1 %vm255_vm2, %v259_v14  ;;  %v432_v17 = vld [vmem:[#allocation2 + $0x12] sm:$0xff] }
  0x20   : > { %657 = vmatprep.mubr.msk.f32.mxu0 %vm255_vm2, %v431_v15  ;;  %648 = vmatmul.mubr.msk.f32.vlgmr.msra.gmra.mrb[0].mxu1 %vm255_vm2, %v260_v16 }
  0x21   : > { %658 = vmatmul.mubr.msk.f32.vlgmr.msra.gmra.mrb[0].mxu0 %vm255_vm2, %v432_v17 }
  0xf3   : > { %v649_v18 = vpop.f32.mrb[0].mxu1 }
  0xf4   : > { %v659_v19 = vpop.f32.mrb[0].mxu0  ;;  %v338_v21 = vpop.f32.mrb[1].mxu1 }
  0xf5   : > { %v660_v20 = vadd.f32 %v659_v19, %v649_v18  ;;  %v509_v22 = vpop.f32.mrb[1].mxu0 }
  0xf6   : > { %v661_v23 = vadd.f32 %v509_v22, %v338_v21 }
  0xf7   : > { %v521_v24 = vsel %vm255_vm2, %v660_v20, 0.0  ;;  %v532_v25 = vmul.f32 %v660_v20, %v660_v20 }
  0xf8   : > { %v520_v26 = vsel %vm255_vm2, %v661_v23, 0.0  ;;  %v531_v27 = vmul.f32 %v661_v23, %v661_v23 }
  0xf9   : > { %v534_v28 = vsel %vm255_vm2, %v532_v25, 0.0  ;;  %v522_v29 = vadd.f32 %v521_v24, %v520_v26 }
  0xfa   : > { %v533_v30 = vsel %vm255_vm2, %v531_v27, 0.0 }
  0xfb   : > { %v523_v31 = vrot.slane %v522_v29, 4  ;;  %v535_v32 = vadd.f32 %v534_v28, %v533_v30 }
  0xfd   : > { %v524_v33 = vadd.f32 %v523_v31, %v522_v29  ;;  %v536_v34 = vrot.slane %v535_v32, 4 }
  0xff   : > { %v525_v35 = vrot.slane %v524_v33, 2  ;;  %v537_v36 = vadd.f32 %v536_v34, %v535_v32 }
 0x101   : > { %v526_v37 = vadd.f32 %v525_v35, %v524_v33  ;;  %v538_v38 = vrot.slane %v537_v36, 2 }
 0x103   : > { %v527_v39 = vrot.slane %v526_v37, 1  ;;  %v539_v40 = vadd.f32 %v538_v38, %v537_v36 }
 0x105   : > { %v528_v41 = vadd.f32 %v527_v39, %v526_v37  ;;  %v540_v42 = vrot.slane %v539_v40, 1 }
 0x107   : > { %530 = vst.msk [vmem:[%s226_s11] sm:$0x1] %vm529_vm3, %v528_v41  ;;  %v541_v43 = vadd.f32 %v540_v42, %v539_v40 }
 0x109   : > { %542 = vst.msk [vmem:[%s229_s14] sm:$0x1] %vm529_vm3, %v541_v43 }
 0x10a PF: > { %s16_s18 = sadd.s32 1, %s679_s18  }
 0x10b   : > { %p13_p4 = scmp.ge.s32.totalorder %s16_s18, 4  }
 0x10d   :  { %15 = sbr.rel (!%p13_p4) target bundleno = 1 (0x1), region = 78 }

// kernel: residual_block_nlc.3
= control target key start
LH: loop header
LB: loop body
LE: loop exit
PB: predicated region body
PF: predicated region fallthrough
CT: control target
= control target key end

     0   :  { %s1065_s24 = smov 0   ;;  %s1153_s0 = inlined_call_operand.vmem [shape: f32[2,16,4], index: 0, kind: input, shape index: {}]   ;;  %s1154_s1 = inlined_call_operand.vmem [shape: f32[1,1,4], index: 1, kind: input, shape index: {}]   ;;  %s1155_s2 = inlined_call_operand.vmem [shape: f32[1,1,4], index: 2, kind: input, shape index: {}]   ;;  %s1156_s3 = inlined_call_operand.vmem [shape: f32[12,4], index: 3, kind: input, shape index: {}]   ;;  %s1157_s4 = inlined_call_operand.vmem [shape: f32[1,1,4], index: 4, kind: input, shape index: {}]   ;;  %s1158_s5 = inlined_call_operand.vmem [shape: f32[1,1,4], index: 5, kind: input, shape index: {}]   ;;  %s1159_s6 = inlined_call_operand.vmem [shape: f32[12,4], index: 6, kind: input, shape index: {}]   ;;  %s1160_s7 = inlined_call_operand.vmem [shape: f32[2,16,4], index: 7, kind: output, shape index: {}]  }
   0x1 LB: > { %s916_s25 = sadd.s32 4294967295, %s1022_s24   ;;  %p920_p0 = scmp.ge.s32.totalorder %s1022_s24, 1  ;;  %s1022_s24 = sphi %s1065_s24, %s17_s24  }
   0x2   : > { %p237_p1 = scmp.lt.s32.totalorder %s1022_s24, 3 }
   0x4   : > { %p238_p2 = pnand %p920_p0, %p237_p1 }
   0x5   : > { %v310_v0 = vld [vmem:[%s1156_s3] sm:$0xf] (!%p238_p2)  ;;  %vm317_vm0 = vcmask (!%p238_p2), 1043456   ;;  %p269_p3 = scmp.lt.s32.totalorder (!%p238_p2), %s916_s25, 1  ;;  %vm301_vm1 = vcmask (!%p238_p2), 25600   ;;  %v1024_v1 = vmov (!%p238_p2), 0.0  }
   0x6   : > { %241 = sbr.rel (%p238_p2) target bundleno = 508 (0x1fc), region = 48  ;;  %969 = vmatprep.subr.msk.mxu0 (!%p238_p2), %vm317_vm0, %v310_v0  ;;  %302 = vst.msk [vmem:[#allocation2 + $0x6] sm:$0x3] (!%p238_p2), %vm301_vm1, %v1024_v1  ;;  %303 = vst.msk [vmem:[#allocation2 + $0x18] sm:$0x3] (!%p238_p2), %vm301_vm1, %v1024_v1  ;;  %vm304_vm2 = vcmask (!%p238_p2), 31744  }
   0x7   : > { %970 = vmatpush3.msk.msra.mxu0 (!%p238_p2), %vm317_vm0, %v310_v0  ;;  %v307_v2 = vld [vmem:[%s1156_s3 + $0x4] sm:$0xf] (!%p238_p2)  ;;  %v925_v3 = vld [vmem:[%s1154_s1] ss:$0 sm:$0xff] (!%p238_p2)  ;;  %v482_v15 = vld [vmem:[%s1156_s3 + $0x8] sm:$0xf] (!%p238_p2) }
   0x8   : > { %974 = vmatprep.subr.msk.mxu0 (!%p238_p2), %vm317_vm0, %v307_v2  ;;  %v926_v6 = vld [vmem:[%s1155_s2] ss:$0 sm:$0xff] (!%p238_p2)  ;;  %vm589_vm3 = vcmask (!%p238_p2), 24576   ;;  %v594_v19 = vld [vmem:[%s1159_s6 + $0x4] sm:$0xf] (!%p238_p2) }
   0x9   : > { %590 = vst.msk [vmem:[#allocation3 + $0x7] sm:$0x1] (!%p238_p2), %vm589_vm3, %v1024_v1  ;;  %591 = vst.msk [vmem:[#allocation3 + $0x18] sm:$0x1] (!%p238_p2), %vm589_vm3, %v1024_v1  ;;  %v597_v18 = vld [vmem:[%s1159_s6] sm:$0xf] (!%p238_p2) }
   0xa   : > { %984 = vmatprep.subr.msk.mxu1 (!%p238_p2), %vm317_vm0, %v597_v18  ;;  %v936_v20 = vld [vmem:[%s1157_s4] ss:$0 sm:$0xff] (!%p238_p2)  ;;  %v768_v32 = vld [vmem:[%s1159_s6 + $0x8] sm:$0xf] (!%p238_p2) }
   0xb   : > { %985 = vmatpush3.msk.msra.mxu1 (!%p238_p2), %vm317_vm0, %v597_v18  ;;  %v937_v22 = vld [vmem:[%s1158_s5] ss:$0 sm:$0xff] (!%p238_p2) }
   0xc   : > { %989 = vmatprep.subr.msk.mxu1 (!%p238_p2), %vm317_vm0, %v594_v19 }
   0xd   : > { %s1162_s25 = smov (!%p269_p3, %s916_s25), 1 }
   0xe   : > { %s949_s30 = sshll.u32 %s1162_s25, 4 }
   0xf   : > { %s273_s12 = scalar_lea.vmem %s1153_s0, %s949_s30  ;;  %s278_s9 = scalar_lea.vmem %s1160_s7, %s949_s30 }
  0x10   : > { %v1093_v4 = vld [vmem:[%s273_s12] sm:$0xff]  ;;  %v280_v5 = vld [vmem:[%s273_s12 + $0x8] sm:$0xff] }
  0x11   : > { %v288_v7 = vmul.f32 %v925_v3, %v1093_v4  ;;  %v289_v8 = vmul.f32 %v925_v3, %v280_v5 }
  0x13   : > { %v297_v9 = vadd.f32 %v926_v6, %v288_v7  ;;  %v298_v10 = vadd.f32 %v926_v6, %v289_v8 }
  0x15   : > { %v299_v11 = vmax.f32 %v297_v9, 0.0  ;;  %v300_v12 = vmax.f32 %v298_v10, 0.0 }
  0x17   : > { %305 = vst.msk [vmem:[#allocation2 + $0x8] sm:$0xff] %vm304_vm2, %v299_v11  ;;  %306 = vst.msk [vmem:[#allocation2 + $0x10] sm:$0xff] %vm304_vm2, %v300_v12 }
  0x1e   : > { %v308_v13 = vld [vmem:[#allocation2 + $0x6] sm:$0xff]  ;;  %v309_v14 = vld [vmem:[#allocation2 + $0xe] sm:$0xff] }
  0x1f   : > { %971 = vmatprep.mubr.msk.f32.mxu0 %vm304_vm2, %v308_v13  ;;  %v480_v16 = vld [vmem:[#allocation2 + $0xa] sm:$0xff]  ;;  %v481_v17 = vld [vmem:[#allocation2 + $0x12] sm:$0xff] }
  0x20   : > { %972 = vmatmul.mubr.msk.f32.vlgmr.msra.gmra.mrb[0].mxu0 %vm304_vm2, %v309_v14 }
  0x21   : > { %975 = vmatpush3.msk.msra.mxu0 %vm317_vm0, %v307_v2  ;;  %976 = vmatprep.mubr.msk.f32.mxu0 %vm304_vm2, %v299_v11 }
  0x22   : > { %979 = vmatprep.subr.msk.mxu0 %vm317_vm0, %v482_v15 }
  0x28   : > { %977 = vmatmul.mubr.msk.f32.vlgmr.msra.gmra.mrb[0].mxu0 %vm304_vm2, %v300_v12 }
  0x29   : > { %980 = vmatpush3.msk.msra.mxu0 %vm317_vm0, %v482_v15  ;;  %981 = vmatprep.mubr.msk.f32.mxu0 %vm304_vm2, %v480_v16 }
  0x30   : > { %982 = vmatmul.mubr.msk.f32.vlgmr.msra.gmra.mrb[0].mxu0 %vm304_vm2, %v481_v17 }
 0x103   : > { %v983_v21 = vpop.f32.mrb[0].mxu0 }
 0x104   : > { %v577_v23 = vmul.f32 %v983_v21, %v936_v20  ;;  %v558_v24 = vpop.f32.mrb[1].mxu0 }
 0x105   : > { %v576_v25 = vmul.f32 %v936_v20, %v558_v24 }
 0x106   : > { %v586_v26 = vadd.f32 %v937_v22, %v577_v23 }
 0x107   : > { %v585_v27 = vadd.f32 %v937_v22, %v576_v25 }
 0x108   : > { %v588_v28 = vmax.f32 %v586_v26, 0.0 }
 0x109   : > { %v587_v29 = vmax.f32 %v585_v27, 0.0 }
 0x10a   : > { %593 = vst.msk [vmem:[#allocation3 + $0x10] sm:$0xff] %vm304_vm2, %v588_v28 }
 0x10b   : > { %592 = vst.msk [vmem:[#allocation3 + $0x8] sm:$0xff] %vm304_vm2, %v587_v29 }
 0x111   : > { %v767_v34 = vld [vmem:[#allocation3 + $0x11] sm:$0xff] }
 0x112   : > { %v595_v30 = vld [vmem:[#allocation3 + $0x7] sm:$0xff]  ;;  %v596_v31 = vld [vmem:[#allocation3 + $0xf] sm:$0xff] }
 0x113   : > { %986 = vmatprep.mubr.msk.f32.mxu1 %vm304_vm2, %v595_v30  ;;  %v766_v33 = vld [vmem:[#allocation3 + $0x9] sm:$0xff] }
 0x114   : > { %987 = vmatmul.mubr.msk.f32.vlgmr.msra.gmra.mrb[0].mxu1 %vm304_vm2, %v596_v31 }
 0x115   : > { %990 = vmatpush3.msk.msra.mxu1 %vm317_vm0, %v594_v19  ;;  %991 = vmatprep.mubr.msk.f32.mxu1 %vm304_vm2, %v587_v29 }
 0x116   : > { %994 = vmatprep.subr.msk.mxu1 %vm317_vm0, %v768_v32 }
 0x11c   : > { %992 = vmatmul.mubr.msk.f32.vlgmr.msra.gmra.mrb[0].mxu1 %vm304_vm2, %v588_v28 }
 0x11d   : > { %995 = vmatpush3.msk.msra.mxu1 %vm317_vm0, %v768_v32  ;;  %996 = vmatprep.mubr.msk.f32.mxu1 %vm304_vm2, %v766_v33 }
 0x124   : > { %997 = vmatmul.mubr.msk.f32.vlgmr.msra.gmra.mrb[0].mxu1 %vm304_vm2, %v767_v34 }
 0x1f7   : > { %v998_v35 = vpop.f32.mrb[0].mxu1 }
 0x1f8   : > { %v858_v36 = vadd.f32 %v998_v35, %v280_v5  ;;  %v844_v37 = vpop.f32.mrb[1].mxu1 }
 0x1f9   : > { %v857_v38 = vadd.f32 %v844_v37, %v1093_v4 }
 0x1fa   : > { %860 = vst.msk [vmem:[%s278_s9 + $0x8] sm:$0xff] %vm304_vm2, %v858_v36 }
 0x1fb   : > { %859 = vst.msk [vmem:[%s278_s9] sm:$0xff] %vm304_vm2, %v857_v38 }
 0x1fc PF: > { %s17_s24 = sadd.s32 1, %s1022_s24  }
 0x1fd   : > { %p14_p4 = scmp.ge.s32.totalorder %s17_s24, 4  }
 0x1ff   :  { %16 = sbr.rel (!%p14_p4) target bundleno = 1 (0x1), region = 78 }

</bundles_post_ra>
